<compile_context>
chip_gen: v7x
topology: tpu7x:2x2x1
jax: 0.10.0
libtpu: 0.0.40
codegen_flags: <defaults>
</compile_context>

<pallas_src>
import jax
import jax.numpy as jnp
from jax.experimental import pallas as pl
from jax.experimental.pallas import tpu as pltpu


def _stepsize_relu_kernel(p_ref, out_ref):
    # All refs live in SMEM: three scalar max(x, 0) ops on the scalar unit.
    # No vector registers, no VMEM tiles, no DMA beyond the tiny SMEM copies.
    zero = jnp.zeros((), dtype=p_ref.dtype)  # explicit dtype, no promotion
    out_ref[0] = jnp.maximum(p_ref[0], zero)
    out_ref[1] = jnp.maximum(p_ref[1], zero)
    out_ref[2] = jnp.maximum(p_ref[2], zero)


def stepsize_arch_forward(params):
    """params: (3,) float32 [tau, sigma, rho] -> three (1,) arrays (ReLU'd).

    Mirrors `stepsize_arch.forward()`, which returns three shape-(1,) tensors.
    Single grid-less pallas_call with one (3,) SMEM output; the three (1,)
    results are produced by trivial slices on the caller side.
    """
    smem_spec = pl.BlockSpec(memory_space=pltpu.MemorySpace.SMEM)
    out = pl.pallas_call(
        _stepsize_relu_kernel,
        out_shape=jax.ShapeDtypeStruct((3,), params.dtype),
        in_specs=[smem_spec],
        out_specs=smem_spec,
    )(params)
    tau = out[0:1]
    sigma = out[1:2]
    rho = out[2:3]
    return tau, sigma, rho


if __name__ == "__main__":
    # Deterministic parameter initialization matching the module's __init__:
    #   tau = 10.0, sigma = 0.01, rho = 1.0
    # plus a small deterministic perturbation from PRNGKey(0) so the ReLU is
    # actually exercised (sigma may be pushed negative).
    key = jax.random.PRNGKey(0)
    base = jnp.array([10.0, 0.01, 1.0], dtype=jnp.float32)
    noise = 0.02 * jax.random.normal(key, base.shape, dtype=jnp.float32)
    params = base + noise  # (3,)

    # Reference (pure JAX), computed up front.
    ref = jnp.maximum(params, 0.0)

    tau, sigma, rho = stepsize_arch_forward(params)
    jax.block_until_ready((tau, sigma, rho))

    assert tau.shape == (1,) and sigma.shape == (1,) and rho.shape == (1,)
    assert jnp.allclose(tau[0], ref[0])
    assert jnp.allclose(sigma[0], ref[1])
    assert jnp.allclose(rho[0], ref[2])

    print("KERNEL_OK")
</pallas_src>

<mosaic_0001>
module attributes {stable_mosaic.version = 11 : i64} {
  func.func @_stepsize_relu_kernel(%arg0: memref<3xf32, #tpu.memory_space<smem>>, %arg1: memref<3xf32, #tpu.memory_space<smem>>) attributes {dimension_semantics = [], scalar_prefetch = 0 : i64, scratch_operands = 0 : i64, tpu.core_type = #tpu.core_type<tc>} {
    %c0 = arith.constant 0 : index
    %0 = memref.load %arg0[%c0] : memref<3xf32, #tpu.memory_space<smem>>
    %cst = arith.constant 0.000000e+00 : f32
    %1 = arith.maximumf %0, %cst : f32
    %c0_0 = arith.constant 0 : index
    %2 = memref.load %arg1[%c0_0] : memref<3xf32, #tpu.memory_space<smem>>
    memref.store %1, %arg1[%c0_0] : memref<3xf32, #tpu.memory_space<smem>>
    %c1 = arith.constant 1 : index
    %3 = memref.load %arg0[%c1] : memref<3xf32, #tpu.memory_space<smem>>
    %cst_1 = arith.constant 0.000000e+00 : f32
    %4 = arith.maximumf %3, %cst_1 : f32
    %c1_2 = arith.constant 1 : index
    %5 = memref.load %arg1[%c1_2] : memref<3xf32, #tpu.memory_space<smem>>
    memref.store %4, %arg1[%c1_2] : memref<3xf32, #tpu.memory_space<smem>>
    %c2 = arith.constant 2 : index
    %6 = memref.load %arg0[%c2] : memref<3xf32, #tpu.memory_space<smem>>
    %cst_3 = arith.constant 0.000000e+00 : f32
    %7 = arith.maximumf %6, %cst_3 : f32
    %c2_4 = arith.constant 2 : index
    %8 = memref.load %arg1[%c2_4] : memref<3xf32, #tpu.memory_space<smem>>
    memref.store %7, %arg1[%c2_4] : memref<3xf32, #tpu.memory_space<smem>>
    return
  }
}

</mosaic_0001>

<bundles_post_ra>
// kernel: tpu_custom_call.1
= control target key start
LH: loop header
LB: loop body
LE: loop exit
PB: predicated region body
PF: predicated region fallthrough
CT: control target
= control target key end

     0   :  { %6 = vsyncpa [#allocation3], 0  ;;  %s112_s0 = inlined_call_operand.hbm [shape: f32[3], index: 0, kind: input, shape index: {}]   ;;  %s113_s1 = inlined_call_operand.hbm [shape: f32[3], index: 1, kind: output, shape index: {}]  }
   0x1   :  { %7 = vsyncpa [#allocation4], 0  ;;  %s51_s8 = scalar_lea.hbm %s112_s0, 16 }
   0x2   :  { %p52_p0 = scmp.ne.s32.totalorder %s112_s0, %s51_s8  ;;  %p55_p1 = scmp.lt.u32.totalorder %s51_s8, %s112_s0 }
   0x4   :  { %p57_p2 = pnand %p55_p1, %p52_p0 }
   0x6   :  { %60 = shalt.err (!%p57_p2)
}
   0x7   :  { %s75_s13 = smov [#allocation2]  }
   0x8   :  { %15 = dma.hbm_to_smem %s112_s0, 16, %s75_s13, [#allocation3]  }
   0x9   :  { %71 = dma.done.wait [#allocation3], 16  }
   0xa   :  { %72 = vsyncadd [#allocation3], 4294967280 }
   0xb   :  { %19 = sfence }
   0xc   :  { %s20_s16 = sld [smem:[#allocation2]]  ;;  %s46_s17 = sld [smem:[#allocation2 + $0x1]] }
   0xd   :  { %s47_s18 = sld [smem:[#allocation2 + $0x2]]  ;;  %s76_s19 = smov 0.0  }
   0xe   :  { %s61_s25 = scalar_lea.hbm %s113_s1, 16 }
   0xf   :  { %p62_p3 = scmp.ne.s32.totalorder %s113_s1, %s61_s25  ;;  %p65_p4 = scmp.lt.u32.totalorder %s61_s25, %s113_s1 }
  0x11   :  { %p67_p5 = pnand %p65_p4, %p62_p3 }
  0x12   :  { %s21_s20 = smax.f32 %s76_s19, %s20_s16  ;;  %s25_s21 = smax.f32 %s76_s19, %s46_s17 }
  0x13   :  { %23 = sst [smem:[#allocation5]] %s21_s20  ;;  %s29_s22 = smax.f32 %s76_s19, %s47_s18 }
  0x14   :  { %27 = sst [smem:[#allocation5 + $0x1]] %s25_s21 }
  0x15   :  { %31 = sst [smem:[#allocation5 + $0x2]] %s29_s22 }
  0x16   :  { %70 = shalt.err (!%p67_p5)
}
  0x17   :  { %s77_s29 = smov [#allocation5]  }
  0x18   :  { %39 = dma.smem_to_hbm %s77_s29, 16, %s113_s1, [#allocation4]  }
  0x19   :  { %73 = dma.done.wait [#allocation4], 16  }
  0x1a   :  { %74 = vsyncadd [#allocation4], 4294967280 }
  0x1b   :  { %43 = sfence }
  0x1c   :  { %44 = vsyncpa [#allocation3], 1 }
  0x1d   :  { %45 = vsyncpa [#allocation4], 1 }

</bundles_post_ra>
